<compile_context>
chip_gen: v6e
topology: v6e:2x2x1
jax: 0.10.0
libtpu: 0.0.40
codegen_flags: <defaults>
</compile_context>

<pallas_src>
import jax
import jax.numpy as jnp
from jax import lax
from jax.experimental import pallas as pl
from jax.experimental.pallas import tpu as pltpu

_LANE = 128
_SUBLANE = 8


def _frozen_bn_kernel(x_ref, scale_ref, bias_ref, o_ref):
    # x tile: (br, bc); scale/bias tiles: (br, 1) float32, broadcast over lanes.
    x = x_ref[...].astype(jnp.float32)
    y = x * scale_ref[...] + bias_ref[...]
    o_ref[...] = y.astype(o_ref.dtype)


def frozen_batch_norm2d(x, weight, bias, running_mean, running_var,
                        eps=1e-5, target_tile_bytes=2 * 1024 * 1024):
    """x: (N, C, H, W); params: (C,). Returns (N, C, H, W), same dtype as x."""
    N, C, H, W = x.shape
    NC, HW = N * C, H * W
    itemsize = jnp.dtype(x.dtype).itemsize

    # --- fold the 4 frozen buffers into per-channel scale/bias (f32) --------
    w = weight.astype(jnp.float32)
    b = bias.astype(jnp.float32)
    rm = running_mean.astype(jnp.float32)
    rv = running_var.astype(jnp.float32)
    scale_c = w * lax.rsqrt(rv + eps)          # w * (rv + eps).rsqrt()
    bias_c = b - rm * scale_c                  # b - rm * scale

    # --- flatten to (N*C, H*W) and pad lane axis to a multiple of 128 -------
    x2 = x.reshape(NC, HW)
    HW_pad = pl.cdiv(HW, _LANE) * _LANE
    if HW_pad != HW:
        x2 = jnp.pad(x2, ((0, 0), (0, HW_pad - HW)))

    # one scale/bias value per (n, c) row, broadcast along lanes in-kernel
    scale_r = jnp.tile(scale_c.reshape(1, C), (N, 1)).reshape(NC, 1)
    bias_r = jnp.tile(bias_c.reshape(1, C), (N, 1)).reshape(NC, 1)

    # --- tile sizing ---------------------------------------------------------
    # lane block: multiple of 128 (or the full padded extent), capped at 2048
    bc = min(HW_pad, 2048)
    # row block: aim for ~target_tile_bytes per x tile; multiple of 8 unless it
    # covers the full row extent.
    rows_for_target = max(_SUBLANE, target_tile_bytes // (bc * itemsize))
    br = min(NC, rows_for_target)
    if br < NC:
        br = max(_SUBLANE, (br // _SUBLANE) * _SUBLANE)
        br = min(br, 1024)

    grid = (pl.cdiv(NC, br), pl.cdiv(HW_pad, bc))

    x_spec = pl.BlockSpec((br, bc), lambda i, j: (i, j))
    p_spec = pl.BlockSpec((br, 1), lambda i, j: (i, 0))   # resident across lanes

    cost = pl.CostEstimate(
        flops=2 * NC * HW_pad,
        transcendentals=0,
        bytes_accessed=2 * NC * HW_pad * itemsize + 2 * NC * 4,
    )

    out2 = pl.pallas_call(
        _frozen_bn_kernel,
        out_shape=jax.ShapeDtypeStruct((NC, HW_pad), x.dtype),
        grid_spec=pltpu.PrefetchScalarGridSpec(
            num_scalar_prefetch=0,
            grid=grid,
            in_specs=[x_spec, p_spec, p_spec],
            out_specs=x_spec,
        ),
        compiler_params=pltpu.CompilerParams(
            dimension_semantics=("parallel", "parallel"),
            vmem_limit_bytes=32 * 1024 * 1024,
        ),
        cost_estimate=cost,
    )(x2, scale_r, bias_r)

    if HW_pad != HW:
        out2 = out2[:, :HW]
    return out2.reshape(N, C, H, W)


def _reference(x, weight, bias, running_mean, running_var, eps=1e-5):
    w = weight.reshape(1, -1, 1, 1)
    b = bias.reshape(1, -1, 1, 1)
    rv = running_var.reshape(1, -1, 1, 1)
    rm = running_mean.reshape(1, -1, 1, 1)
    scale = w * lax.rsqrt(rv + eps)
    return x * scale + (b - rm * scale)


if __name__ == "__main__":
    key = jax.random.PRNGKey(0)

    def make_case(key, N, C, H, W):
        kx, kw, kb, km, kv = jax.random.split(key, 5)
        x = jax.random.normal(kx, (N, C, H, W), dtype=jnp.float32)
        weight = jax.random.normal(kw, (C,), dtype=jnp.float32)
        bias = jax.random.normal(kb, (C,), dtype=jnp.float32)
        running_mean = jax.random.normal(km, (C,), dtype=jnp.float32)
        running_var = jnp.abs(jax.random.normal(kv, (C,), dtype=jnp.float32)) + 0.5
        return x, weight, bias, running_mean, running_var

    k1, k2 = jax.random.split(key)

    # Case 1: lane-aligned spatial dims (H*W multiple of 128).
    args1 = make_case(k1, 2, 4, 16, 16)
    out1 = jax.block_until_ready(frozen_batch_norm2d(*args1))
    ref1 = _reference(*args1)
    assert out1.shape == (2, 4, 16, 16)
    assert jnp.allclose(out1, ref1, atol=1e-5, rtol=1e-5)

    # Case 2: ragged spatial dims (7x7) and N*C < 8 — exercises lane padding
    # and the full-extent row block.
    args2 = make_case(k2, 2, 3, 7, 7)
    out2 = jax.block_until_ready(frozen_batch_norm2d(*args2))
    ref2 = _reference(*args2)
    assert out2.shape == (2, 3, 7, 7)
    assert jnp.allclose(out2, ref2, atol=1e-5, rtol=1e-5)

    print("KERNEL_OK")
</pallas_src>

<mosaic_0001>
module attributes {stable_mosaic.version = 11 : i64} {
  func.func @_frozen_bn_kernel(%arg0: i32, %arg1: i32, %arg2: memref<8x256xf32, #tpu.memory_space<vmem>>, %arg3: memref<8x1xf32, #tpu.memory_space<vmem>>, %arg4: memref<8x1xf32, #tpu.memory_space<vmem>>, %arg5: memref<8x256xf32, #tpu.memory_space<vmem>>) attributes {dimension_semantics = [#tpu.dimension_semantics<parallel>, #tpu.dimension_semantics<parallel>], iteration_bounds = array<i64: 1, 1>, scalar_prefetch = 0 : i64, scratch_operands = 0 : i64, tpu.core_type = #tpu.core_type<tc>, window_params = [{transform_indices = @transform_0, window_bounds = array<i64: 8, 256>}, {transform_indices = @transform_1, window_bounds = array<i64: 8, 1>}, {transform_indices = @transform_2, window_bounds = array<i64: 8, 1>}, {transform_indices = @transform_3, window_bounds = array<i64: 8, 256>}]} {
    %c0 = arith.constant 0 : index
    %c0_0 = arith.constant 0 : index
    %0 = vector.load %arg2[%c0, %c0_0] : memref<8x256xf32, #tpu.memory_space<vmem>>, vector<8x256xf32>
    %c0_1 = arith.constant 0 : index
    %c0_2 = arith.constant 0 : index
    %1 = vector.load %arg3[%c0_1, %c0_2] : memref<8x1xf32, #tpu.memory_space<vmem>>, vector<8x1xf32>
    %2 = vector.broadcast %1 : vector<8x1xf32> to vector<8x256xf32>
    %3 = arith.mulf %0, %2 : vector<8x256xf32>
    %c0_3 = arith.constant 0 : index
    %c0_4 = arith.constant 0 : index
    %4 = vector.load %arg4[%c0_3, %c0_4] : memref<8x1xf32, #tpu.memory_space<vmem>>, vector<8x1xf32>
    %5 = vector.broadcast %4 : vector<8x1xf32> to vector<8x256xf32>
    %6 = arith.addf %3, %5 : vector<8x256xf32>
    %c0_5 = arith.constant 0 : index
    %c0_6 = arith.constant 0 : index
    %7 = vector.load %arg5[%c0_5, %c0_6] : memref<8x256xf32, #tpu.memory_space<vmem>>, vector<8x256xf32>
    tpu.vector_store %arg5[%c0_5, %c0_6], %6 {strides = array<i32>} : memref<8x256xf32, #tpu.memory_space<vmem>>, vector<8x256xf32>,
    return
  }
  func.func @transform_0(%arg0: i32, %arg1: i32) -> (i32, i32) {
    %c0_i32 = arith.constant 0 : i32
    return %arg0, %arg1 : i32, i32
  }
  func.func @transform_1(%arg0: i32, %arg1: i32) -> (i32, i32) {
    %c0_i32 = arith.constant 0 : i32
    %c0_i32_0 = arith.constant 0 : i32
    return %arg0, %c0_i32 : i32, i32
  }
  func.func @transform_2(%arg0: i32, %arg1: i32) -> (i32, i32) {
    %c0_i32 = arith.constant 0 : i32
    %c0_i32_0 = arith.constant 0 : i32
    return %arg0, %c0_i32 : i32, i32
  }
  func.func @transform_3(%arg0: i32, %arg1: i32) -> (i32, i32) {
    %c0_i32 = arith.constant 0 : i32
    return %arg0, %arg1 : i32, i32
  }
}

</mosaic_0001>

<bundles_post_ra>
// kernel: tpu_custom_call.1
= control target key start
LH: loop header
LB: loop body
LE: loop exit
PB: predicated region body
PF: predicated region fallthrough
CT: control target
= control target key end

     0   :  { %v74_v1 = vmov 0   ;;  %s111_s0 = inlined_call_operand.vmem [shape: f32[8,256], index: 0, kind: input, shape index: {}]   ;;  %s112_s1 = inlined_call_operand.vmem [shape: f32[8,1], index: 1, kind: input, shape index: {}]   ;;  %s113_s2 = inlined_call_operand.vmem [shape: f32[8,1], index: 2, kind: input, shape index: {}]   ;;  %s114_s3 = inlined_call_operand.hbm [shape: f32[8,256], index: 3, kind: output, shape index: {}]  }
   0x1   :  { %v17_v0 = vld [vmem:[%s112_s1] sm:$0xff]  ;;  %51 = vset.pattern.permute.xlu0 %v74_v1 }
   0x2   :  { %8 = vsyncpa [#allocation3], 0  ;;  %20 = vperm.xlu0 %51, %v17_v0   ;;  %v25_v2 = vld [vmem:[%s113_s2] sm:$0xff]  ;;  %v16_v5 = vld [vmem:[%s111_s0 + $0x8] sm:$0xff]  ;;  %s75_s20 = smov [#allocation2]  }
   0x3   :  { %v15_v4 = vld [vmem:[%s111_s0] sm:$0xff]  ;;  %s41_s1 = sshll.u32 %s75_s20, 4  ;;  %s42_s1 = int_to_ptr.vmem [resolvable:$true] %s41_s1 }
   0x4   :  { %s52_s2 = scalar_lea.vmem %s42_s1, 256  ;;  %p57_p1 = scmp.lt.s32.totalorder %s42_s1, %s42_s1 }
   0x5   :  { %p53_p0 = scmp.ne.s32.totalorder %s42_s1, %s52_s2  ;;  %p58_p2 = scmp.lt.s32.totalorder %s52_s2, %s52_s2 }
   0x6   :  { %28 = vperm.xlu0 %51, %v25_v2  }
   0x7   :  { %p59_p3 = por %p58_p2, %p57_p1 }
   0x9   :  { %p60_p4 = pnand %p59_p3, %p53_p0 }
  0x7d   :  { %v21_v3 = vpop.permute.xlu0 %20 }
  0x7e   :  { %v23_v6 = vmul.f32 %v21_v3, %v15_v4  ;;  %v24_v7 = vmul.f32 %v21_v3, %v16_v5 }
  0x81   :  { %v29_v8 = vpop.permute.xlu0 %28 }
  0x82   :  { %v31_v9 = vadd.f32 %v29_v8, %v23_v6  ;;  %v32_v10 = vadd.f32 %v29_v8, %v24_v7 }
  0x84   :  { %33 = vst [vmem:[#allocation2] sm:$0xff] %v31_v9  ;;  %34 = vst [vmem:[#allocation2 + $0x8] sm:$0xff] %v32_v10 }
  0x85   :  { %63 = shalt.err (!%p60_p4)
}
  0x86   :  { %44 = dma.vmem_to_hbm [thread:$0]  %s42_s1, 256, %s114_s3, [#allocation3]  }
  0x87   :  { %72 = dma.done.wait [#allocation3], 256  }
  0x88   :  { %73 = vsyncadd [#allocation3], 4294967040 }
  0x89   :  { %48 = vsyncpa [#allocation3], 1 }

</bundles_post_ra>
